<compile_context>
chip_gen: v7x
topology: tpu7x:2x2x1
jax: 0.10.0
libtpu: 0.0.40
codegen_flags: <defaults>
</compile_context>

<pallas_src>
import jax
import jax.numpy as jnp
from jax.experimental import pallas as pl
from jax.experimental.pallas import tpu as pltpu


def _round_up(x, m):
    return ((x + m - 1) // m) * m


def _round_down(x, m):
    return (x // m) * m


def _linear_logits_kernel(x_ref, w_ref, b_ref, o_ref):
    x = x_ref[...]
    w = w_ref[...]
    if x.dtype != w.dtype:
        # Free-ish VPU cast inside the kernel; avoids a wrapper-side HBM pass.
        x = x.astype(w.dtype)
    acc = jnp.dot(x, w, preferred_element_type=jnp.float32)
    o_ref[...] = (acc + b_ref[...]).astype(o_ref.dtype)


def _vmem_capacity_bytes():
    try:
        return int(pltpu.get_tpu_info().vmem_capacity_bytes)
    except Exception:
        return 64 << 20          # conservative (v7x-sized) fallback


def linear_logits(x, w, b2d, *, vmem_budget_bytes=None):
    """logits = x @ w + b, computed in one Pallas TPU kernel.

    x: [N, F]; w: [F, C] (f32 or bf16, pre-cast by caller); b2d: [1, C] f32.
    Returns [N, C] float32 logits.  No padding/cast passes over HBM happen
    here — the only HBM traffic outside the kernel is the inputs themselves.
    """
    n, f = x.shape
    f2, c = w.shape
    assert f == f2 and b2d.shape == (1, c)

    xbytes = jnp.dtype(x.dtype).itemsize
    wbytes = jnp.dtype(w.dtype).itemsize
    obytes = 4

    vmem_cap = _vmem_capacity_bytes()
    budget = (int(vmem_budget_bytes) if vmem_budget_bytes is not None
              else int(vmem_cap * 0.45))
    limit = max(32 << 20, int(vmem_cap * 0.70))

    row_align = 16 if xbytes == 2 else 8

    # ---- class-dim tile tc (W kept VMEM-resident per C tile) ---------------
    # Pallas double-buffers every input by default -> count W and bias 2x.
    def w_cost(tc):
        return 2 * f * tc * wbytes + 2 * 8 * max(tc, 128) * 4

    min_stream = 2 * row_align * (f * xbytes + c * obytes)
    if w_cost(c) + min_stream <= budget:
        tc = c                                           # whole head resident
    else:
        tc = _round_down(int(budget * 0.6) // max(2 * f * wbytes, 1), 128)
        if c >= 128:
            tc = max(128, min(tc, _round_down(c, 128)))  # multiple of 128
        tc = max(1, min(tc, c)) if c < 128 else tc
        tc = min(tc, c)

    # ---- batch tile tm sized by bytes (no hard row cap) --------------------
    per_row = 2 * (f * xbytes + tc * obytes)             # double-buffered X + out
    remaining = max(budget - w_cost(tc), per_row * row_align)
    tm_vmem = remaining // per_row
    tm_target = max(row_align, (2 << 20) // max(f * xbytes + tc * obytes, 1))
    tm = min(tm_vmem, tm_target, _round_up(n, row_align))
    if n >= 2 * row_align:          # >=2 grid steps => both v7x TCs get work
        tm = min(tm, _round_up(pl.cdiv(n, 2), row_align))
    tm = max(row_align, _round_down(tm, row_align))

    n_c = pl.cdiv(c, tc)
    n_n = pl.cdiv(n, tm)
    grid = (n_c, n_n)               # C outer, N inner: each W tile fetched once

    cost = pl.CostEstimate(
        flops=int(2 * n * f * c),
        transcendentals=0,
        bytes_accessed=int(n_c * n * f * xbytes       # X (restreamed per C tile)
                           + f * c * wbytes           # W
                           + c * 4                    # bias
                           + n * c * obytes),         # logits out
    )

    return pl.pallas_call(
        _linear_logits_kernel,
        out_shape=jax.ShapeDtypeStruct((n, c), jnp.float32),
        grid_spec=pl.GridSpec(
            grid=grid,
            in_specs=[
                pl.BlockSpec((tm, f), lambda j, i: (i, 0)),   # X: streamed over N
                pl.BlockSpec((f, tc), lambda j, i: (0, j)),   # W: resident per C tile
                pl.BlockSpec((1, tc), lambda j, i: (0, j)),   # bias
            ],
            out_specs=pl.BlockSpec((tm, tc), lambda j, i: (i, j)),
        ),
        compiler_params=pltpu.CompilerParams(
            dimension_semantics=("parallel", "parallel"),
            vmem_limit_bytes=limit,
        ),
        cost_estimate=cost,
    )(x, w, b2d)


class PallasModel:
    """JAX/Pallas analogue of the (abstract) torch Model base class, made
    concrete with a linear classification head.  Weight padding/casting is
    done once here so each forward pass issues exactly one pallas_call."""

    def __init__(self, in_features: int, num_classes: int, key):
        kw, kb = jax.random.split(key)
        # Deterministic init (synthetic weights, not a checkpoint load).
        self.w = (jax.random.normal(kw, (in_features, num_classes), jnp.float32)
                  * (1.0 / jnp.sqrt(jnp.float32(in_features))))
        self.b = jax.random.normal(kb, (num_classes,), jnp.float32) * 0.01
        # Cached kernel-ready operands (no per-call HBM passes).
        self.w_bf16 = self.w.astype(jnp.bfloat16)
        self.b2d = self.b.reshape(1, num_classes).astype(jnp.float32)

    def forward(self, x, use_bf16=False):
        w = self.w_bf16 if use_bf16 else self.w
        return linear_logits(x, w, self.b2d)

    def __call__(self, x):
        return self.forward(x)

    def predict(self, x):
        # mirrors torch `predict`: no-grad forward, return host array
        import numpy as np
        return np.asarray(jax.device_get(self.forward(x)))


if __name__ == "__main__":
    key = jax.random.PRNGKey(0)
    k_x, k_m, k_x2, k_m2, k_x3, k_m3 = jax.random.split(key, 6)

    # --- tiny shapes (C << 128: unpadded masked-store path) ----------------
    batch, in_features, num_classes = 8, 32, 8
    x = jax.random.normal(k_x, (batch, in_features), jnp.float32)
    model = PallasModel(in_features, num_classes, k_m)

    logits = jax.block_until_ready(model(x))
    ref = x @ model.w + model.b
    assert logits.shape == (batch, num_classes)
    assert jnp.allclose(logits, ref, atol=1e-5, rtol=1e-5)

    # bf16-W path (X cast to bf16 inside the kernel, f32 accumulate)
    logits_bf16 = jax.block_until_ready(model.forward(x, use_bf16=True))
    assert logits_bf16.shape == (batch, num_classes)
    assert jnp.allclose(logits_bf16, ref, atol=5e-2, rtol=5e-2)

    # --- medium shapes (partial last N tile, C not a multiple of 128) ------
    n2, f2v, c2 = 300, 256, 200
    x2 = jax.random.normal(k_x2, (n2, f2v), jnp.float32)
    model2 = PallasModel(f2v, c2, k_m2)
    out2 = jax.block_until_ready(model2(x2))
    ref2 = x2 @ model2.w + model2.b
    assert out2.shape == (n2, c2)
    assert jnp.allclose(out2, ref2, atol=5e-3, rtol=5e-3)

    # --- forced C-tiling fallback (tiny VMEM budget => tc=128, 2-D grid) ---
    n3, f3v, c3 = 64, 256, 512
    x3 = jax.random.normal(k_x3, (n3, f3v), jnp.float32)
    model3 = PallasModel(f3v, c3, k_m3)
    out3 = jax.block_until_ready(
        linear_logits(x3, model3.w, model3.b2d, vmem_budget_bytes=600_000))
    ref3 = x3 @ model3.w + model3.b
    assert out3.shape == (n3, c3)
    assert jnp.allclose(out3, ref3, atol=5e-3, rtol=5e-3)

    print("KERNEL_OK")
</pallas_src>

<mosaic_0001>
module attributes {stable_mosaic.version = 11 : i64} {
  func.func @_linear_logits_kernel(%arg0: i32, %arg1: i32, %arg2: memref<8x32xf32, #tpu.memory_space<vmem>>, %arg3: memref<32x8xf32, #tpu.memory_space<vmem>>, %arg4: memref<1x8xf32, #tpu.memory_space<vmem>>, %arg5: memref<8x8xf32, #tpu.memory_space<vmem>>) attributes {dimension_semantics = [#tpu.dimension_semantics<parallel>, #tpu.dimension_semantics<parallel>], iteration_bounds = array<i64: 1, 1>, scalar_prefetch = 0 : i64, scratch_operands = 0 : i64, tpu.core_type = #tpu.core_type<tc>, window_params = [{transform_indices = @transform_0, window_bounds = array<i64: 8, 32>}, {transform_indices = @transform_1, window_bounds = array<i64: 32, 8>}, {transform_indices = @transform_2, window_bounds = array<i64: 1, 8>}, {transform_indices = @transform_3, window_bounds = array<i64: 8, 8>}]} {
    %c0 = arith.constant 0 : index
    %c0_0 = arith.constant 0 : index
    %0 = vector.load %arg2[%c0, %c0_0] : memref<8x32xf32, #tpu.memory_space<vmem>>, vector<8x32xf32>
    %c0_1 = arith.constant 0 : index
    %c0_2 = arith.constant 0 : index
    %1 = vector.load %arg3[%c0_1, %c0_2] : memref<32x8xf32, #tpu.memory_space<vmem>>, vector<32x8xf32>
    %cst = arith.constant dense<0.000000e+00> : vector<8x8xf32>
    %2 = tpu.matmul %0, %1, %cst {dimension_numbers = #tpu.dot_dimension_numbers<[1], [0], [0], [1], [0, 0, 1, 1], [], []>} : vector<8x32xf32>, vector<32x8xf32>, vector<8x8xf32> -> vector<8x8xf32>
    %c0_3 = arith.constant 0 : index
    %c0_4 = arith.constant 0 : index
    %3 = vector.load %arg4[%c0_3, %c0_4] : memref<1x8xf32, #tpu.memory_space<vmem>>, vector<1x8xf32>
    %4 = vector.broadcast %3 : vector<1x8xf32> to vector<8x8xf32>
    %5 = arith.addf %2, %4 : vector<8x8xf32>
    %c0_5 = arith.constant 0 : index
    %c0_6 = arith.constant 0 : index
    %6 = vector.load %arg5[%c0_5, %c0_6] : memref<8x8xf32, #tpu.memory_space<vmem>>, vector<8x8xf32>
    tpu.vector_store %arg5[%c0_5, %c0_6], %5 {strides = array<i32>} : memref<8x8xf32, #tpu.memory_space<vmem>>, vector<8x8xf32>,
    return
  }
  func.func @transform_0(%arg0: i32, %arg1: i32) -> (i32, i32) {
    %c0_i32 = arith.constant 0 : i32
    %c0_i32_0 = arith.constant 0 : i32
    return %arg1, %c0_i32 : i32, i32
  }
  func.func @transform_1(%arg0: i32, %arg1: i32) -> (i32, i32) {
    %c0_i32 = arith.constant 0 : i32
    %c0_i32_0 = arith.constant 0 : i32
    return %c0_i32, %arg0 : i32, i32
  }
  func.func @transform_2(%arg0: i32, %arg1: i32) -> (i32, i32) {
    %c0_i32 = arith.constant 0 : i32
    %c0_i32_0 = arith.constant 0 : i32
    return %c0_i32, %arg0 : i32, i32
  }
  func.func @transform_3(%arg0: i32, %arg1: i32) -> (i32, i32) {
    %c0_i32 = arith.constant 0 : i32
    return %arg1, %arg0 : i32, i32
  }
}

</mosaic_0001>

<bundles_post_ra>
// kernel: tpu_custom_call.1
= control target key start
LH: loop header
LB: loop body
LE: loop exit
PB: predicated region body
PF: predicated region fallthrough
CT: control target
= control target key end

     0   :  { %v169_v3 = vmov 0.0|0.0   ;;  %vm170_vm0 = vmmov 0   ;;  %v171_v6 = vmov 0.0   ;;  %s223_s0 = inlined_call_operand.vmem [shape: f32[8,32], index: 0, kind: input, shape index: {}]   ;;  %s224_s1 = inlined_call_operand.vmem [shape: f32[32,8], index: 1, kind: input, shape index: {}]   ;;  %s225_s2 = inlined_call_operand.vmem [shape: f32[1,8], index: 2, kind: input, shape index: {}]   ;;  %s226_s3 = inlined_call_operand.hbm [shape: f32[8,8], index: 3, kind: output, shape index: {}]  }
   0x1   :  { %v16_v0 = vld [vmem:[%s224_s1] sm:$0xff]  ;;  %v17_v1 = vld [vmem:[%s224_s1 + $0x8] sm:$0xff]  ;;  %v18_v2 = vld [vmem:[%s224_s1 + $0x10] sm:$0xff]  ;;  %135 = vmatprep.subr.bf16.mxu0 %v169_v3  ;;  %132 = vmatprep.mubr.msk.f32.mxu0 %vm170_vm0, %v171_v6 }
   0x2   :  { %v136_v4 = vpack.c.bf16 %v17_v1, %v16_v0  ;;  %v19_v5 = vld [vmem:[%s224_s1 + $0x18] sm:$0xff] }
   0x3   :  { %8 = vsyncpa [#allocation3], 0  ;;  %v139_v7 = vpack.c.bf16 %v19_v5, %v18_v2  ;;  %v15_v8 = vld [vmem:[%s223_s0] sm:$0xff]  ;;  %vm27_vm1 = vcmask 261120   ;;  %s172_s24 = smov [#allocation2]   ;;  %vm101_vm2 = vcmask 64512  }
   0x4   :  { %137 = vmatpush3.bf16.msra.mxu0 %v136_v4  ;;  %v117_v9 = vld [vmem:[%s225_s2] ss:$0 sm:$0xff]  ;;  %s109_s1 = sshll.u32 %s172_s24, 4  ;;  %s110_s1 = int_to_ptr.vmem [resolvable:$true] %s109_s1 }
   0x5   :  { %138 = vmatprep.subr.bf16.mxu0 %v169_v3  ;;  %s145_s25 = scalar_lea.vmem %s110_s1, 128  ;;  %p150_p1 = scmp.lt.s32.totalorder %s110_s1, %s110_s1 }
   0x6   :  { %p146_p0 = scmp.ne.s32.totalorder %s110_s1, %s145_s25  ;;  %p151_p2 = scmp.lt.s32.totalorder %s145_s25, %s145_s25 }
   0x8   :  { %140 = vmatpush3.bf16.msra.mxu0 %v139_v7  ;;  %p152_p3 = por %p151_p2, %p150_p1 }
   0xa   :  { %p153_p4 = pnand %p152_p3, %p146_p0 }
   0xb   :  { %133 = vmatmul.mubr.msk.f32.vlgmr.msra.gmra.mrb[0].mxu0 %vm27_vm1, %v15_v8 }
  0xde   :  { %v97_v10 = vpop.f32.mrb[0].mxu0 }
  0xdf   :  { %v98_v11 = vadd.f32 %v117_v9, %v97_v10  ;;  %v134_v12 = vpop.f32.mrb[1].mxu0 }
  0xe1   :  { %102 = vst.msk [vmem:[#allocation2] sm:$0xff] %vm101_vm2, %v98_v11 }
  0xe2   :  { %156 = shalt.err (!%p153_p4)
}
  0xe3   :  { %s157_s27 = scalar_lea.hbm %s226_s3, 128 }
  0xe4   :  { %p158_p5 = scmp.ne.s32.totalorder %s226_s3, %s157_s27  ;;  %p161_p6 = scmp.lt.u32.totalorder %s157_s27, %s226_s3 }
  0xe6   :  { %p163_p7 = pnand %p161_p6, %p158_p5 }
  0xe8   :  { %166 = shalt.err (!%p163_p7)
}
  0xe9   :  { %112 = dma.vmem_to_hbm [thread:$0]  %s110_s1, 128, %s226_s3, [#allocation3]  }
  0xea   :  { %167 = dma.done.wait [#allocation3], 128  }
  0xeb   :  { %168 = vsyncadd [#allocation3], 4294967168 }
  0xec   :  { %116 = vsyncpa [#allocation3], 1 }

</bundles_post_ra>
